<compile_context>
chip_gen: v7x
topology: tpu7x:2x2x1
jax: 0.10.0
libtpu: 0.0.40
codegen_flags: <defaults>
</compile_context>

<pallas_src>
import functools

import jax
import jax.numpy as jnp
from jax.experimental import pallas as pl
from jax.experimental.pallas import tpu as pltpu


NEG_SLOPE = 0.01          # PyTorch nn.LeakyReLU default
LANE = 128                # lane width
SUBLANE = 8               # f32 sublane count

_TB_CANDIDATES = (2048, 1024, 512, 256, 128, 64, 32, 16, 8)
_VMEM_TILE_BUDGET = 24 * 1024 * 1024   # headroom under the explicit limit
_VMEM_LIMIT_BYTES = 32 * 1024 * 1024   # safe on v5e/v6e and v7x (64 MiB phys)


def _round_up(n, m):
    return ((n + m - 1) // m) * m


def _choose_batch_tile(b8, din8, dout_pad, max_dim, weight_bytes):
    """Largest batch tile whose double-buffered footprint fits the budget."""
    def usage(tb):
        return (2 * tb * din8 * 4          # x tile, double-buffered (f32)
                + 2 * tb * dout_pad * 4    # out tile, double-buffered (f32)
                + 2 * weight_bytes         # resident bf16 weights (2 bufs)
                + 4 * tb * max_dim * 4)    # live activations / spill slack
    tb = SUBLANE
    for cand in _TB_CANDIDATES:
        if cand <= max(b8, SUBLANE) and usage(cand) <= _VMEM_TILE_BUDGET:
            tb = cand
            break
    # Keep >= 2 grid steps when the batch allows it, so the "parallel" batch
    # axis can shard across both TensorCores on v7x.
    if tb >= b8 and b8 >= 2 * SUBLANE:
        tb = max(SUBLANE, _round_up((b8 + 1) // 2, SUBLANE))
    return tb


def _mlp_fused_kernel(*refs, num_layers, neg_slope):
    """refs = (x_ref, w0, b0, w1, b1, ..., w_{L-1}, b_{L-1}, o_ref)."""
    x_ref = refs[0]
    o_ref = refs[-1]

    h = x_ref[...].astype(jnp.float32)
    for i in range(num_layers):
        w = refs[1 + 2 * i][...]                         # bf16 (din_p, dout_p)
        b = refs[2 + 2 * i][...].astype(jnp.float32)     # (1, dout_p) -> f32
        # bf16 MXU inputs, f32 accumulation; elementwise math stays f32.
        y = jnp.dot(h.astype(w.dtype), w,
                    preferred_element_type=jnp.float32) + b
        h = jnp.maximum(y, neg_slope * y)                # LeakyReLU
    o_ref[...] = h.astype(o_ref.dtype)


def init_mlp_params(key, input_dims, hidden_dims, output_dims, layer_count,
                    dtype=jnp.float32):
    """Unpadded params mirroring nn.Linear default init, stored as (in, out)."""
    dims = [input_dims] + [hidden_dims] * layer_count + [output_dims]
    params = []
    for i in range(len(dims) - 1):
        din, dout = dims[i], dims[i + 1]
        key, kw, kb = jax.random.split(key, 3)
        bound = 1.0 / jnp.sqrt(jnp.asarray(din, dtype))
        w = jax.random.uniform(kw, (din, dout), dtype, -bound, bound)
        b = jax.random.uniform(kb, (1, dout), dtype, -bound, bound)
        params.append((w, b))
    return params


def pad_mlp_params(params, dtype=jnp.bfloat16):
    """One-time zero-pad + bf16 cast.

    First layer's input dim pads only to a sublane multiple (keeps the HBM
    read of x narrow); hidden/output dims pad to lane multiples (lane-dense
    matmuls and unmasked stores).
    """
    padded = []
    for i, (w, b) in enumerate(params):
        din, dout = w.shape
        din_p = _round_up(din, SUBLANE if i == 0 else LANE)
        dout_p = _round_up(dout, LANE)
        wp = jnp.zeros((din_p, dout_p), dtype).at[:din, :dout].set(
            w.astype(dtype))
        bp = jnp.zeros((1, dout_p), dtype).at[:, :dout].set(b.astype(dtype))
        padded.append((wp, bp))
    return padded


def mlp_forward(x, padded_params, output_dims, neg_slope=NEG_SLOPE):
    """Fused MLP forward. x: [B, Din] (unpadded). Returns [B, output_dims]."""
    B, Din = x.shape
    num_layers = len(padded_params)
    din8 = padded_params[0][0].shape[0]        # 8-aligned first-layer in-dim
    dout_pad = padded_params[-1][0].shape[1]   # 128-aligned last-layer out-dim
    assert Din <= din8

    max_dim = max([din8] + [w.shape[1] for w, _ in padded_params])
    weight_bytes = sum(w.size * w.dtype.itemsize + b.size * b.dtype.itemsize
                       for w, b in padded_params)

    b8 = _round_up(B, SUBLANE)
    tb = _choose_batch_tile(b8, din8, dout_pad, max_dim, weight_bytes)
    b_pad = _round_up(B, tb)

    # Only pad what the tiling requires (batch to a tile multiple, features
    # to the 8-aligned first-layer width); no 128-wide lane inflation of x in
    # HBM, and no copy at all when the shapes already line up.
    if (b_pad, din8) != (B, Din):
        x_in = jnp.zeros((b_pad, din8), x.dtype).at[:B, :Din].set(x)
    else:
        x_in = x

    flat_params = []
    in_specs = [pl.BlockSpec((tb, din8), lambda i: (i, 0))]
    for w, b in padded_params:
        flat_params += [w, b]
        # Grid-invariant blocks: weights/biases stay VMEM-resident across
        # grid steps (constant index_map => no re-DMA per step).
        in_specs.append(pl.BlockSpec(w.shape, lambda i: (0, 0)))
        in_specs.append(pl.BlockSpec(b.shape, lambda i: (0, 0)))

    out_itemsize = jnp.dtype(x.dtype).itemsize
    flops = sum(2 * b_pad * w.shape[0] * w.shape[1] for w, _ in padded_params)
    bytes_accessed = (x_in.size * jnp.dtype(x_in.dtype).itemsize
                      + weight_bytes
                      + b_pad * dout_pad * out_itemsize)

    kernel = functools.partial(_mlp_fused_kernel,
                               num_layers=num_layers, neg_slope=neg_slope)

    out_pad = pl.pallas_call(
        kernel,
        out_shape=jax.ShapeDtypeStruct((b_pad, dout_pad), x.dtype),
        grid=(b_pad // tb,),
        in_specs=in_specs,
        out_specs=pl.BlockSpec((tb, dout_pad), lambda i: (i, 0)),
        compiler_params=pltpu.CompilerParams(
            dimension_semantics=("parallel",),
            vmem_limit_bytes=_VMEM_LIMIT_BYTES,
        ),
        cost_estimate=pl.CostEstimate(
            flops=flops, transcendentals=0, bytes_accessed=bytes_accessed),
    )(x_in, *flat_params)

    return out_pad[:B, :output_dims]


def mlp_forward_ref(x, params):
    """Pure-JAX f32 reference on the UNPADDED params."""
    for w, b in params:
        y = x @ w + b
        x = jnp.maximum(y, NEG_SLOPE * y)
    return x


if __name__ == "__main__":
    key = jax.random.PRNGKey(0)
    k_params, k_x = jax.random.split(key)

    batch = 4
    input_dims, hidden_dims, output_dims, layer_count = 16, 32, 8, 2

    params = init_mlp_params(k_params, input_dims, hidden_dims, output_dims,
                             layer_count)
    padded_params = pad_mlp_params(params)          # bf16, padded once
    x = jax.random.normal(k_x, (batch, input_dims), jnp.float32)

    fwd = jax.jit(functools.partial(mlp_forward, output_dims=output_dims))
    out = jax.block_until_ready(fwd(x, padded_params))

    ref = mlp_forward_ref(x, params)
    assert out.shape == (batch, output_dims)
    assert bool(jnp.all(jnp.isfinite(out)))
    # bf16 matmul inputs with f32 accumulation vs. the pure-f32 reference.
    assert jnp.allclose(out, ref, atol=5e-2, rtol=5e-2), (out, ref)

    print("KERNEL_OK")
</pallas_src>

<mosaic_0001>
module attributes {stable_mosaic.version = 11 : i64} {
  func.func @_mlp_fused_kernel(%arg0: i32, %arg1: memref<8x16xf32, #tpu.memory_space<vmem>>, %arg2: memref<16x128xbf16, #tpu.memory_space<vmem>>, %arg3: memref<1x128xbf16, #tpu.memory_space<vmem>>, %arg4: memref<128x128xbf16, #tpu.memory_space<vmem>>, %arg5: memref<1x128xbf16, #tpu.memory_space<vmem>>, %arg6: memref<128x128xbf16, #tpu.memory_space<vmem>>, %arg7: memref<1x128xbf16, #tpu.memory_space<vmem>>, %arg8: memref<8x128xf32, #tpu.memory_space<vmem>>) attributes {dimension_semantics = [#tpu.dimension_semantics<parallel>], iteration_bounds = array<i64: 1>, scalar_prefetch = 0 : i64, scratch_operands = 0 : i64, tpu.core_type = #tpu.core_type<tc>, window_params = [{transform_indices = @transform_0, window_bounds = array<i64: 8, 16>}, {pipeline_mode = #tpu.pipeline_mode<synchronous>, transform_indices = @transform_1, window_bounds = array<i64: 16, 128>}, {pipeline_mode = #tpu.pipeline_mode<synchronous>, transform_indices = @transform_2, window_bounds = array<i64: 1, 128>}, {pipeline_mode = #tpu.pipeline_mode<synchronous>, transform_indices = @transform_3, window_bounds = array<i64: 128, 128>}, {pipeline_mode = #tpu.pipeline_mode<synchronous>, transform_indices = @transform_4, window_bounds = array<i64: 1, 128>}, {pipeline_mode = #tpu.pipeline_mode<synchronous>, transform_indices = @transform_5, window_bounds = array<i64: 128, 128>}, {pipeline_mode = #tpu.pipeline_mode<synchronous>, transform_indices = @transform_6, window_bounds = array<i64: 1, 128>}, {transform_indices = @transform_7, window_bounds = array<i64: 8, 128>}]} {
    %c0 = arith.constant 0 : index
    %c0_0 = arith.constant 0 : index
    %0 = vector.load %arg1[%c0, %c0_0] : memref<8x16xf32, #tpu.memory_space<vmem>>, vector<8x16xf32>
    %c0_1 = arith.constant 0 : index
    %c0_2 = arith.constant 0 : index
    %1 = vector.load %arg2[%c0_1, %c0_2] : memref<16x128xbf16, #tpu.memory_space<vmem>>, vector<16x128xbf16>
    %c0_3 = arith.constant 0 : index
    %c0_4 = arith.constant 0 : index
    %2 = vector.load %arg3[%c0_3, %c0_4] : memref<1x128xbf16, #tpu.memory_space<vmem>>, vector<1x128xbf16>
    %3 = arith.extf %2 : vector<1x128xbf16> to vector<1x128xf32>
    %4 = arith.truncf %0 : vector<8x16xf32> to vector<8x16xbf16>
    %cst = arith.constant dense<0.000000e+00> : vector<8x128xf32>
    %5 = tpu.matmul %4, %1, %cst {dimension_numbers = #tpu.dot_dimension_numbers<[1], [0], [0], [1], [0, 0, 1, 1], [], []>} : vector<8x16xbf16>, vector<16x128xbf16>, vector<8x128xf32> -> vector<8x128xf32>
    %6 = vector.broadcast %3 : vector<1x128xf32> to vector<8x128xf32>
    %7 = arith.addf %5, %6 : vector<8x128xf32>
    %cst_5 = arith.constant 0.00999999977 : f32
    %8 = vector.broadcast %cst_5 : f32 to vector<8x128xf32>
    %9 = arith.mulf %8, %7 : vector<8x128xf32>
    %10 = arith.maximumf %7, %9 : vector<8x128xf32>
    %c0_6 = arith.constant 0 : index
    %c0_7 = arith.constant 0 : index
    %11 = vector.load %arg4[%c0_6, %c0_7] : memref<128x128xbf16, #tpu.memory_space<vmem>>, vector<128x128xbf16>
    %c0_8 = arith.constant 0 : index
    %c0_9 = arith.constant 0 : index
    %12 = vector.load %arg5[%c0_8, %c0_9] : memref<1x128xbf16, #tpu.memory_space<vmem>>, vector<1x128xbf16>
    %13 = arith.extf %12 : vector<1x128xbf16> to vector<1x128xf32>
    %14 = arith.truncf %10 : vector<8x128xf32> to vector<8x128xbf16>
    %cst_10 = arith.constant dense<0.000000e+00> : vector<8x128xf32>
    %15 = tpu.matmul %14, %11, %cst_10 {dimension_numbers = #tpu.dot_dimension_numbers<[1], [0], [0], [1], [0, 0, 1, 1], [], []>} : vector<8x128xbf16>, vector<128x128xbf16>, vector<8x128xf32> -> vector<8x128xf32>
    %16 = vector.broadcast %13 : vector<1x128xf32> to vector<8x128xf32>
    %17 = arith.addf %15, %16 : vector<8x128xf32>
    %cst_11 = arith.constant 0.00999999977 : f32
    %18 = vector.broadcast %cst_11 : f32 to vector<8x128xf32>
    %19 = arith.mulf %18, %17 : vector<8x128xf32>
    %20 = arith.maximumf %17, %19 : vector<8x128xf32>
    %c0_12 = arith.constant 0 : index
    %c0_13 = arith.constant 0 : index
    %21 = vector.load %arg6[%c0_12, %c0_13] : memref<128x128xbf16, #tpu.memory_space<vmem>>, vector<128x128xbf16>
    %c0_14 = arith.constant 0 : index
    %c0_15 = arith.constant 0 : index
    %22 = vector.load %arg7[%c0_14, %c0_15] : memref<1x128xbf16, #tpu.memory_space<vmem>>, vector<1x128xbf16>
    %23 = arith.extf %22 : vector<1x128xbf16> to vector<1x128xf32>
    %24 = arith.truncf %20 : vector<8x128xf32> to vector<8x128xbf16>
    %cst_16 = arith.constant dense<0.000000e+00> : vector<8x128xf32>
    %25 = tpu.matmul %24, %21, %cst_16 {dimension_numbers = #tpu.dot_dimension_numbers<[1], [0], [0], [1], [0, 0, 1, 1], [], []>} : vector<8x128xbf16>, vector<128x128xbf16>, vector<8x128xf32> -> vector<8x128xf32>
    %26 = vector.broadcast %23 : vector<1x128xf32> to vector<8x128xf32>
    %27 = arith.addf %25, %26 : vector<8x128xf32>
    %cst_17 = arith.constant 0.00999999977 : f32
    %28 = vector.broadcast %cst_17 : f32 to vector<8x128xf32>
    %29 = arith.mulf %28, %27 : vector<8x128xf32>
    %30 = arith.maximumf %27, %29 : vector<8x128xf32>
    %c0_18 = arith.constant 0 : index
    %c0_19 = arith.constant 0 : index
    %31 = vector.load %arg8[%c0_18, %c0_19] : memref<8x128xf32, #tpu.memory_space<vmem>>, vector<8x128xf32>
    tpu.vector_store %arg8[%c0_18, %c0_19], %30 {strides = array<i32>} : memref<8x128xf32, #tpu.memory_space<vmem>>, vector<8x128xf32>,
    return
  }
  func.func @transform_0(%arg0: i32) -> (i32, i32) {
    %c0_i32 = arith.constant 0 : i32
    %c0_i32_0 = arith.constant 0 : i32
    return %arg0, %c0_i32 : i32, i32
  }
  func.func @transform_1(%arg0: i32) -> (i32, i32) {
    %c0_i32 = arith.constant 0 : i32
    %c0_i32_0 = arith.constant 0 : i32
    %c0_i32_1 = arith.constant 0 : i32
    return %c0_i32, %c0_i32_0 : i32, i32
  }
  func.func @transform_2(%arg0: i32) -> (i32, i32) {
    %c0_i32 = arith.constant 0 : i32
    %c0_i32_0 = arith.constant 0 : i32
    %c0_i32_1 = arith.constant 0 : i32
    return %c0_i32, %c0_i32_0 : i32, i32
  }
  func.func @transform_3(%arg0: i32) -> (i32, i32) {
    %c0_i32 = arith.constant 0 : i32
    %c0_i32_0 = arith.constant 0 : i32
    %c0_i32_1 = arith.constant 0 : i32
    return %c0_i32, %c0_i32_0 : i32, i32
  }
  func.func @transform_4(%arg0: i32) -> (i32, i32) {
    %c0_i32 = arith.constant 0 : i32
    %c0_i32_0 = arith.constant 0 : i32
    %c0_i32_1 = arith.constant 0 : i32
    return %c0_i32, %c0_i32_0 : i32, i32
  }
  func.func @transform_5(%arg0: i32) -> (i32, i32) {
    %c0_i32 = arith.constant 0 : i32
    %c0_i32_0 = arith.constant 0 : i32
    %c0_i32_1 = arith.constant 0 : i32
    return %c0_i32, %c0_i32_0 : i32, i32
  }
  func.func @transform_6(%arg0: i32) -> (i32, i32) {
    %c0_i32 = arith.constant 0 : i32
    %c0_i32_0 = arith.constant 0 : i32
    %c0_i32_1 = arith.constant 0 : i32
    return %c0_i32, %c0_i32_0 : i32, i32
  }
  func.func @transform_7(%arg0: i32) -> (i32, i32) {
    %c0_i32 = arith.constant 0 : i32
    %c0_i32_0 = arith.constant 0 : i32
    return %arg0, %c0_i32 : i32, i32
  }
}

</mosaic_0001>

<bundles_post_ra>
// kernel: mlp_forward.1
= control target key start
LH: loop header
LB: loop body
LE: loop exit
PB: predicated region body
PF: predicated region fallthrough
CT: control target
= control target key end

     0   :  { %12 = vsyncpa [#allocation3], 0  ;;  %s613_s0 = inlined_call_operand.vmem [shape: f32[8,16], index: 0, kind: input, shape index: {}]   ;;  %s614_s1 = inlined_call_operand.vmem [shape: bf16[16,128], index: 1, kind: input, shape index: {}]   ;;  %s615_s2 = inlined_call_operand.vmem [shape: bf16[1,128], index: 2, kind: input, shape index: {}]   ;;  %s616_s3 = inlined_call_operand.hbm [shape: bf16[128,128], index: 3, kind: input, shape index: {}]   ;;  %s617_s4 = inlined_call_operand.vmem [shape: bf16[1,128], index: 4, kind: input, shape index: {}]   ;;  %s618_s5 = inlined_call_operand.hbm [shape: bf16[128,128], index: 5, kind: input, shape index: {}]   ;;  %s619_s6 = inlined_call_operand.vmem [shape: bf16[1,128], index: 6, kind: input, shape index: {}]   ;;  %s620_s7 = inlined_call_operand.vmem [shape: f32[8,128], index: 7, kind: output, shape index: {}]  }
   0x1   :  { %13 = vsyncpa [#allocation5], 0  ;;  %s505_s24 = smov [#allocation2]   ;;  %s457_s28 = scalar_lea.hbm %s616_s3, 1024 }
   0x2   :  { %s25_s25 = sshll.u32 %s505_s24, 4  ;;  %p458_p0 = scmp.ne.s32.totalorder %s616_s3, %s457_s28  ;;  %s26_s25 = int_to_ptr.vmem [resolvable:$true] %s25_s25 }
   0x3   :  { %p461_p1 = scmp.lt.u32.totalorder %s457_s28, %s616_s3 }
   0x5   :  { %p463_p2 = pnand %p461_p1, %p458_p0 }
   0x7   :  { %466 = shalt.err (!%p463_p2)
}
   0x8   :  { %s467_s10 = scalar_lea.vmem %s26_s25, 1024  ;;  %p472_p4 = scmp.lt.s32.totalorder %s26_s25, %s26_s25 }
   0x9   :  { %p468_p3 = scmp.ne.s32.totalorder %s26_s25, %s467_s10  ;;  %p473_p5 = scmp.lt.s32.totalorder %s467_s10, %s467_s10 }
   0xb   :  { %p474_p6 = por %p473_p5, %p472_p4 }
   0xd   :  { %p475_p7 = pnand %p474_p6, %p468_p3 }
   0xf   :  { %478 = shalt.err (!%p475_p7)
}
  0x10   :  { %s506_s11 = smov 64   ;;  %s507_s12 = smov 4  }
  0x11   :  { %31 = dma.hbm_to_vmem [thread:$0]  %s616_s3, 1024, %s26_s25, [#allocation3], %s506_s11, %s506_s11, %s507_s12  }
  0x12   :  { %s508_s15 = smov [#allocation4]   ;;  %s479_s19 = scalar_lea.hbm %s618_s5, 1024 }
  0x13   :  { %s39_s16 = sshll.u32 %s508_s15, 4  ;;  %p480_p8 = scmp.ne.s32.totalorder %s618_s5, %s479_s19  ;;  %s40_s16 = int_to_ptr.vmem [resolvable:$true] %s39_s16 }
  0x14   :  { %p483_p9 = scmp.lt.u32.totalorder %s479_s19, %s618_s5 }
  0x16   :  { %p485_p10 = pnand %p483_p9, %p480_p8 }
  0x18   :  { %488 = shalt.err (!%p485_p10)
}
  0x19   :  { %s489_s24 = scalar_lea.vmem %s40_s16, 1024  ;;  %p494_p12 = scmp.lt.s32.totalorder %s40_s16, %s40_s16 }
  0x1a   :  { %p490_p11 = scmp.ne.s32.totalorder %s40_s16, %s489_s24  ;;  %p495_p13 = scmp.lt.s32.totalorder %s489_s24, %s489_s24 }
  0x1c   :  { %p496_p0 = por %p495_p13, %p494_p12 }
  0x1e   :  { %p497_p1 = pnand %p496_p0, %p490_p11 }
  0x20   :  { %500 = shalt.err (!%p497_p1)
}
  0x21   :  { %45 = dma.hbm_to_vmem [thread:$0]  %s618_s5, 1024, %s40_s16, [#allocation5], %s506_s11, %s506_s11, %s507_s12  }
  0x22   :  { %501 = dma.done.wait [#allocation3], 1024  }
  0x23   :  { %502 = vsyncadd [#allocation3], 4294966272 }
  0x24   :  { %503 = dma.done.wait [#allocation5], 1024  }
  0x25   :  { %504 = vsyncadd [#allocation5], 4294966272  ;;  %v509_v0 = vmov 0.0   ;;  %vm510_vm0 = vmmov 0   ;;  %v440_v1 = vld [vmem:[%s614_s1] sm:$0xff]   ;;  %vm71_vm1 = vcmask 130048   ;;  %v61_v18 = vlaneseq }
  0x26   :  { %388 = vmatprep.subr.bf16.mxu0 %v509_v0  ;;  %390 = vmatprep.mubr.msk.bf16.mxu0 %vm510_vm0, %v509_v0  ;;  %v55_v2 = vld [vmem:[%s613_s0] sm:$0xff]  ;;  %v442_v5 = vld [vmem:[#allocation2 + $0x8] sm:$0xff]   ;;  %v443_v6 = vld [vmem:[#allocation2 + $0x10] sm:$0xff]  }
  0x27   :  { %394 = vmatprep.subr.bf16.mxu1 %v509_v0  ;;  %410 = vmatprep.mubr.msk.bf16.mxu1 %vm510_vm0, %v509_v0  ;;  %v60_v3 = vpack.c.bf16 %v55_v2, %v55_v2  ;;  %v441_v4 = vld [vmem:[#allocation2] sm:$0xff]   ;;  %v444_v7 = vld [vmem:[#allocation2 + $0x18] sm:$0xff]   ;;  %v446_v9 = vld [vmem:[#allocation2 + $0x28] sm:$0xff]   ;;  %v62_v19 = vshrl.u32 %v61_v18, 7 }
  0x28   :  { %389 = vmatpush3.bf16.msra.mxu0 %v440_v1  ;;  %395 = vmatpush3.bf16.msra.mxu1 %v441_v4  ;;  %v445_v8 = vld [vmem:[#allocation2 + $0x20] sm:$0xff]   ;;  %v447_v10 = vld [vmem:[#allocation2 + $0x30] sm:$0xff]   ;;  %v448_v11 = vld [vmem:[#allocation2 + $0x38] sm:$0xff]  }
  0x29   :  { %414 = vmatprep.subr.bf16.mxu0 %v509_v0  ;;  %396 = vmatprep.subr.bf16.mxu1 %v509_v0  ;;  %v449_v12 = vld [vmem:[#allocation4] sm:$0xff]   ;;  %v450_v13 = vld [vmem:[#allocation4 + $0x8] sm:$0xff]   ;;  %v451_v14 = vld [vmem:[#allocation4 + $0x10] sm:$0xff]   ;;  %v63_v22 = vsub.s32 0, %v62_v19 }
  0x2a   :  { %v452_v15 = vld [vmem:[#allocation4 + $0x18] sm:$0xff]   ;;  %v453_v16 = vld [vmem:[#allocation4 + $0x20] sm:$0xff]   ;;  %v454_v17 = vld [vmem:[#allocation4 + $0x28] sm:$0xff]  }
  0x2b   :  { %391 = vmatmul.mubr.msk.bf16.vlgmr.msra.gmra.mrb[0].mxu0 %vm71_vm1, %v60_v3  ;;  %v58_v20 = vld [vmem:[%s615_s2] sm:$0x1]  ;;  %v455_v32 = vld [vmem:[#allocation4 + $0x30] sm:$0xff]   ;;  %v456_v33 = vld [vmem:[#allocation4 + $0x38] sm:$0xff]  }
  0x2c   :  { %430 = vmatprep.mubr.msk.bf16.mxu0 %vm510_vm0, %v509_v0  ;;  %397 = vmatpush3.bf16.msra.mxu1 %v442_v5  ;;  %v59_v21 = vunpack.c.l.bf16 %v58_v20  ;;  %v133_v34 = vld [vmem:[%s617_s4] sm:$0x1] }
  0x2d   :  { %398 = vmatprep.subr.bf16.mxu1 %v509_v0  ;;  %415 = vmatpush3.bf16.msra.mxu0 %v449_v12  ;;  %v134_v35 = vunpack.c.l.bf16 %v133_v34  ;;  %v246_v45 = vld [vmem:[%s619_s6] sm:$0x1] }
  0x2e   :  { %416 = vmatprep.subr.bf16.mxu0 %v509_v0  ;;  %v64_v23 = vrot.slane %v59_v21, %v63_v22  ;;  %v247_v46 = vunpack.c.l.bf16 %v246_v45 }
  0x2f   :  { %v139_v36 = vrot.slane %v134_v35, %v63_v22 }
  0x30   :  { %399 = vmatpush3.bf16.msra.mxu1 %v443_v6  ;;  %v252_v47 = vrot.slane %v247_v46, %v63_v22 }
  0x31   :  { %400 = vmatprep.subr.bf16.mxu1 %v509_v0  ;;  %417 = vmatpush3.bf16.msra.mxu0 %v450_v13 }
  0x32   :  { %418 = vmatprep.subr.bf16.mxu0 %v509_v0 }
  0x34   :  { %401 = vmatpush3.bf16.msra.mxu1 %v444_v7 }
  0x35   :  { %402 = vmatprep.subr.bf16.mxu1 %v509_v0  ;;  %419 = vmatpush3.bf16.msra.mxu0 %v451_v14 }
  0x36   :  { %420 = vmatprep.subr.bf16.mxu0 %v509_v0 }
  0x38   :  { %403 = vmatpush3.bf16.msra.mxu1 %v445_v8 }
  0x39   :  { %404 = vmatprep.subr.bf16.mxu1 %v509_v0  ;;  %421 = vmatpush3.bf16.msra.mxu0 %v452_v15 }
  0x3a   :  { %422 = vmatprep.subr.bf16.mxu0 %v509_v0 }
  0x3c   :  { %405 = vmatpush3.bf16.msra.mxu1 %v446_v9 }
  0x3d   :  { %406 = vmatprep.subr.bf16.mxu1 %v509_v0  ;;  %423 = vmatpush3.bf16.msra.mxu0 %v453_v16 }
  0x3e   :  { %424 = vmatprep.subr.bf16.mxu0 %v509_v0 }
  0x40   :  { %407 = vmatpush3.bf16.msra.mxu1 %v447_v10 }
  0x41   :  { %408 = vmatprep.subr.bf16.mxu1 %v509_v0  ;;  %425 = vmatpush3.bf16.msra.mxu0 %v454_v17 }
  0x42   :  { %426 = vmatprep.subr.bf16.mxu0 %v509_v0 }
  0x44   :  { %409 = vmatpush3.bf16.msra.mxu1 %v448_v11 }
  0x45   :  { %427 = vmatpush3.bf16.msra.mxu0 %v455_v32 }
  0x46   :  { %428 = vmatprep.subr.bf16.mxu0 %v509_v0 }
  0x49   :  { %429 = vmatpush3.bf16.msra.mxu0 %v456_v33 }
  0xfe   :  { %v109_v24 = vpop.f32.mrb[0].mxu0 }
  0xff   :  { %v110_v25 = vadd.f32 %v109_v24, %v64_v23  ;;  %v392_v26 = vpop.f32.mrb[1].mxu0 }
 0x100   :  { %v112_v27 = vpop.f32.mrb[2].mxu0 }
 0x101   :  { %v115_v28 = vmul.f32 0.01, %v110_v25  ;;  %v393_v29 = vpop.f32.mrb[3].mxu0 }
 0x103   :  { %v116_v30 = vmax.f32 %v110_v25, %v115_v28 }
 0x105   :  { %v135_v31 = vpack.c.bf16 %v116_v30, %v116_v30 }
 0x107   :  { %411 = vmatmul.mubr.bf16.vlgmr.msra.gmra.mrb[0].mxu1 %v135_v31 }
 0x1da   :  { %v222_v37 = vpop.f32.mrb[0].mxu1 }
 0x1db   :  { %v223_v38 = vadd.f32 %v222_v37, %v139_v36  ;;  %v412_v39 = vpop.f32.mrb[1].mxu1 }
 0x1dc   :  { %v225_v40 = vpop.f32.mrb[2].mxu1 }
 0x1dd   :  { %v228_v41 = vmul.f32 0.01, %v223_v38  ;;  %v413_v42 = vpop.f32.mrb[3].mxu1 }
 0x1df   :  { %v229_v43 = vmax.f32 %v223_v38, %v228_v41 }
 0x1e1   :  { %v248_v44 = vpack.c.bf16 %v229_v43, %v229_v43 }
 0x1e3   :  { %431 = vmatmul.mubr.bf16.vlgmr.msra.gmra.mrb[4].mxu0 %v248_v44 }
 0x2b6   :  { %v335_v48 = vpop.f32.mrb[4].mxu0 }
 0x2b7   :  { %v336_v49 = vadd.f32 %v335_v48, %v252_v47  ;;  %v432_v50 = vpop.f32.mrb[5].mxu0 }
 0x2b8   :  { %v338_v51 = vpop.f32.mrb[6].mxu0 }
 0x2b9   :  { %v341_v52 = vmul.f32 0.01, %v336_v49  ;;  %v433_v53 = vpop.f32.mrb[7].mxu0 }
 0x2bb   :  { %v342_v54 = vmax.f32 %v336_v49, %v341_v52 }
 0x2bd   :  { %343 = vst [vmem:[%s620_s7] sm:$0xff] %v342_v54 }
 0x2be   :  { %348 = vsyncpa [#allocation3], 1 }
 0x2bf   :  { %349 = vsyncpa [#allocation5], 1 }

</bundles_post_ra>
